<compile_context>
chip_gen: v5e
topology: v5e:2x2
jax: 0.10.0
libtpu: 0.0.40
codegen_flags: <defaults>
</compile_context>

<pallas_src>
import functools

import jax
import jax.numpy as jnp
from jax.experimental import pallas as pl
from jax.experimental.pallas import tpu as pltpu

_INV_SQRT2 = 0.7071067811865476


def _mlp_kernel(x_ref, w1_ref, b1_ref, w2_ref, b2_ref, o_ref, *,
                approximate_gelu, bf16_matmul):
    # x_ref:  (TM, D_in)      w1_ref: (D_in, H)   b1_ref: (1, H)
    # w2_ref: (H, D_out)      b2_ref: (1, D_out)  o_ref:  (TM, D_out)
    x = x_ref[...]
    w1 = w1_ref[...]
    w2 = w2_ref[...]
    if bf16_matmul:
        # bf16 operands -> single-pass MXU cadence; accumulate stays f32.
        x = x.astype(jnp.bfloat16)
        w1 = w1.astype(jnp.bfloat16)
        w2 = w2.astype(jnp.bfloat16)

    # First linear (MXU, f32 accumulate) + bias.
    h = jnp.dot(x, w1, preferred_element_type=jnp.float32) + b1_ref[...]

    if approximate_gelu:
        # tanh approximation runs on the EUP (its own bundle slot -> ~free),
        # at the cost of ~1e-3 deviation from torch's exact erf GELU.
        h = jax.nn.gelu(h, approximate=True)
    else:
        # Exact erf GELU (matches torch.nn.GELU() default).
        h = 0.5 * h * (1.0 + jax.lax.erf(h * _INV_SQRT2))

    if bf16_matmul:
        h = h.astype(jnp.bfloat16)

    # Second linear + bias.
    out = jnp.dot(h, w2, preferred_element_type=jnp.float32) + b2_ref[...]
    o_ref[...] = out.astype(o_ref.dtype)


def _round_up(x, m):
    return ((x + m - 1) // m) * m


def _choose_tiling(m, block_rows):
    """Pick (tile_rows, padded_rows, num_tiles) for the row axis.

    - tile rows are capped by `block_rows`; default is large because the kernel
      is memory-bound and small tiles leave the HBM pipeline unramped,
    - if there are >= 16 rows, force >= 2 grid steps so the 'parallel' grid
      axis can shard across both TensorCores on v7x (no effect on v5e/v6e),
    - tile rows are a multiple of 8 (sublane), padding waste is kept minimal.
    """
    m8 = _round_up(max(m, 1), 8)
    n_tiles = max(1, pl.cdiv(m8, block_rows))
    if n_tiles == 1 and m8 >= 16:
        n_tiles = 2
    tm = _round_up(pl.cdiv(m8, n_tiles), 8)
    m_pad = tm * n_tiles
    return tm, m_pad, n_tiles


def _resident_spec(block_shape):
    """Weights/biases: constant block index across the grid -> single-buffer."""
    index_map = lambda i: (0, 0)
    if hasattr(pl, "Buffered"):
        try:
            return pl.BlockSpec(block_shape, index_map,
                                pipeline_mode=pl.Buffered(1))
        except TypeError:  # older jax without pipeline_mode kwarg
            pass
    return pl.BlockSpec(block_shape, index_map)


@functools.partial(
    jax.jit, static_argnames=("block_rows", "approximate_gelu", "bf16_matmul"))
def mlp_projector(x, w1, b1, w2, b2, *, block_rows=2048,
                  approximate_gelu=False, bf16_matmul=False):
    """x: (..., input_dim) float32. Returns (..., output_dim)."""
    orig_shape = x.shape
    d_in = orig_shape[-1]
    d_hidden = w1.shape[1]
    d_out = w2.shape[1]

    # Flatten leading dims into a row axis; pad rows up to tile multiple.
    x2 = x.reshape(-1, d_in)
    m = x2.shape[0]
    tm, m_pad, n_tiles = _choose_tiling(m, block_rows)
    if m_pad != m:
        x2 = jnp.pad(x2, ((0, m_pad - m), (0, 0)))

    # Biases as (1, F) so the kernel only handles 2-D tiles.
    b1_2d = b1.reshape(1, d_hidden)
    b2_2d = b2.reshape(1, d_out)

    kernel = functools.partial(_mlp_kernel,
                               approximate_gelu=approximate_gelu,
                               bf16_matmul=bf16_matmul)

    out = pl.pallas_call(
        kernel,
        out_shape=jax.ShapeDtypeStruct((m_pad, d_out), x.dtype),
        grid=(n_tiles,),
        in_specs=[
            pl.BlockSpec((tm, d_in), lambda i: (i, 0)),  # x tile (pipelined)
            _resident_spec((d_in, d_hidden)),            # w1 (resident)
            _resident_spec((1, d_hidden)),               # b1 (resident)
            _resident_spec((d_hidden, d_out)),           # w2 (resident)
            _resident_spec((1, d_out)),                  # b2 (resident)
        ],
        out_specs=pl.BlockSpec((tm, d_out), lambda i: (i, 0)),
        compiler_params=pltpu.CompilerParams(
            dimension_semantics=("parallel",),
        ),
    )(x2, w1, b1_2d, w2, b2_2d)

    out = out[:m]
    return out.reshape(*orig_shape[:-1], d_out)


def init_params(key, input_dim=90, hidden_dim=128, output_dim=128,
                dtype=jnp.float32):
    """Deterministic init mimicking torch.nn.Linear (uniform +/- 1/sqrt(fan_in))."""
    k1, k2, k3, k4 = jax.random.split(key, 4)
    bound1 = 1.0 / jnp.sqrt(jnp.float32(input_dim))
    bound2 = 1.0 / jnp.sqrt(jnp.float32(hidden_dim))
    # Stored as (in, out) so the kernel does x @ W (== torch's x @ W.T).
    w1 = jax.random.uniform(k1, (input_dim, hidden_dim), dtype, -bound1, bound1)
    b1 = jax.random.uniform(k2, (hidden_dim,), dtype, -bound1, bound1)
    w2 = jax.random.uniform(k3, (hidden_dim, output_dim), dtype, -bound2, bound2)
    b2 = jax.random.uniform(k4, (output_dim,), dtype, -bound2, bound2)
    return w1, b1, w2, b2


def _reference(x, w1, b1, w2, b2):
    h = x @ w1 + b1
    h = 0.5 * h * (1.0 + jax.lax.erf(h / jnp.sqrt(2.0)))
    return h @ w2 + b2


if __name__ == "__main__":
    key = jax.random.PRNGKey(0)
    k_param, k_x1, k_x2 = jax.random.split(key, 3)

    input_dim, hidden_dim, output_dim = 90, 128, 128
    w1, b1, w2, b2 = init_params(k_param, input_dim, hidden_dim, output_dim)

    # Small shape consistent with the module: (batch=2, seq=8, 90) -> (2, 8, 128).
    batch, seq = 2, 8
    x = jax.random.normal(k_x1, (batch, seq, input_dim), dtype=jnp.float32)
    y = jax.block_until_ready(mlp_projector(x, w1, b1, w2, b2))
    y_ref = _reference(x, w1, b1, w2, b2)
    assert y.shape == (batch, seq, output_dim), y.shape
    assert jnp.allclose(y, y_ref, atol=1e-5, rtol=1e-5), \
        float(jnp.max(jnp.abs(y - y_ref)))

    # Second small shape: row count not a multiple of 8, exercises padding and
    # the >=2-tile grid split.
    x2 = jax.random.normal(k_x2, (3, 35, input_dim), dtype=jnp.float32)
    y2 = jax.block_until_ready(mlp_projector(x2, w1, b1, w2, b2))
    y2_ref = _reference(x2, w1, b1, w2, b2)
    assert y2.shape == (3, 35, output_dim), y2.shape
    assert jnp.allclose(y2, y2_ref, atol=1e-5, rtol=1e-5), \
        float(jnp.max(jnp.abs(y2 - y2_ref)))

    print("KERNEL_OK")
</pallas_src>

<mosaic_0001>
module attributes {stable_mosaic.version = 11 : i64} {
  func.func @_mlp_kernel(%arg0: i32, %arg1: memref<8x90xf32, #tpu.memory_space<vmem>>, %arg2: memref<90x128xf32, #tpu.memory_space<vmem>>, %arg3: memref<1x128xf32, #tpu.memory_space<vmem>>, %arg4: memref<128x128xf32, #tpu.memory_space<vmem>>, %arg5: memref<1x128xf32, #tpu.memory_space<vmem>>, %arg6: memref<8x128xf32, #tpu.memory_space<vmem>>) attributes {dimension_semantics = [#tpu.dimension_semantics<parallel>], iteration_bounds = array<i64: 2>, scalar_prefetch = 0 : i64, scratch_operands = 0 : i64, tpu.core_type = #tpu.core_type<tc>, window_params = [{transform_indices = @transform_0, window_bounds = array<i64: 8, 90>}, {pipeline_mode = #tpu.pipeline_mode<synchronous>, transform_indices = @transform_1, window_bounds = array<i64: 90, 128>}, {pipeline_mode = #tpu.pipeline_mode<synchronous>, transform_indices = @transform_2, window_bounds = array<i64: 1, 128>}, {pipeline_mode = #tpu.pipeline_mode<synchronous>, transform_indices = @transform_3, window_bounds = array<i64: 128, 128>}, {pipeline_mode = #tpu.pipeline_mode<synchronous>, transform_indices = @transform_4, window_bounds = array<i64: 1, 128>}, {transform_indices = @transform_5, window_bounds = array<i64: 8, 128>}]} {
    %c0 = arith.constant 0 : index
    %c0_0 = arith.constant 0 : index
    %0 = vector.load %arg1[%c0, %c0_0] : memref<8x90xf32, #tpu.memory_space<vmem>>, vector<8x90xf32>
    %c0_1 = arith.constant 0 : index
    %c0_2 = arith.constant 0 : index
    %1 = vector.load %arg2[%c0_1, %c0_2] : memref<90x128xf32, #tpu.memory_space<vmem>>, vector<90x128xf32>
    %c0_3 = arith.constant 0 : index
    %c0_4 = arith.constant 0 : index
    %2 = vector.load %arg4[%c0_3, %c0_4] : memref<128x128xf32, #tpu.memory_space<vmem>>, vector<128x128xf32>
    %cst = arith.constant dense<0.000000e+00> : vector<8x128xf32>
    %3 = tpu.matmul %0, %1, %cst {dimension_numbers = #tpu.dot_dimension_numbers<[1], [0], [0], [1], [0, 0, 1, 1], [], []>} : vector<8x90xf32>, vector<90x128xf32>, vector<8x128xf32> -> vector<8x128xf32>
    %c0_5 = arith.constant 0 : index
    %c0_6 = arith.constant 0 : index
    %4 = vector.load %arg3[%c0_5, %c0_6] : memref<1x128xf32, #tpu.memory_space<vmem>>, vector<1x128xf32>
    %5 = vector.broadcast %4 : vector<1x128xf32> to vector<8x128xf32>
    %6 = arith.addf %3, %5 : vector<8x128xf32>
    %cst_7 = arith.constant 5.000000e-01 : f32
    %7 = vector.broadcast %cst_7 : f32 to vector<8x128xf32>
    %8 = arith.mulf %7, %6 : vector<8x128xf32>
    %cst_8 = arith.constant 0.707106769 : f32
    %9 = vector.broadcast %cst_8 : f32 to vector<8x128xf32>
    %10 = arith.mulf %6, %9 : vector<8x128xf32>
    %11 = math.erf %10 : vector<8x128xf32>
    %cst_9 = arith.constant 1.000000e+00 : f32
    %12 = vector.broadcast %cst_9 : f32 to vector<8x128xf32>
    %13 = arith.addf %12, %11 : vector<8x128xf32>
    %14 = arith.mulf %8, %13 : vector<8x128xf32>
    %cst_10 = arith.constant dense<0.000000e+00> : vector<8x128xf32>
    %15 = tpu.matmul %14, %2, %cst_10 {dimension_numbers = #tpu.dot_dimension_numbers<[1], [0], [0], [1], [0, 0, 1, 1], [], []>} : vector<8x128xf32>, vector<128x128xf32>, vector<8x128xf32> -> vector<8x128xf32>
    %c0_11 = arith.constant 0 : index
    %c0_12 = arith.constant 0 : index
    %16 = vector.load %arg5[%c0_11, %c0_12] : memref<1x128xf32, #tpu.memory_space<vmem>>, vector<1x128xf32>
    %17 = vector.broadcast %16 : vector<1x128xf32> to vector<8x128xf32>
    %18 = arith.addf %15, %17 : vector<8x128xf32>
    %c0_13 = arith.constant 0 : index
    %c0_14 = arith.constant 0 : index
    %19 = vector.load %arg6[%c0_13, %c0_14] : memref<8x128xf32, #tpu.memory_space<vmem>>, vector<8x128xf32>
    tpu.vector_store %arg6[%c0_13, %c0_14], %18 {strides = array<i32>} : memref<8x128xf32, #tpu.memory_space<vmem>>, vector<8x128xf32>,
    return
  }
  func.func @transform_0(%arg0: i32) -> (i32, i32) {
    %c0_i32 = arith.constant 0 : i32
    %c0_i32_0 = arith.constant 0 : i32
    return %arg0, %c0_i32 : i32, i32
  }
  func.func @transform_1(%arg0: i32) -> (i32, i32) {
    %c0_i32 = arith.constant 0 : i32
    %c0_i32_0 = arith.constant 0 : i32
    %c0_i32_1 = arith.constant 0 : i32
    return %c0_i32, %c0_i32_0 : i32, i32
  }
  func.func @transform_2(%arg0: i32) -> (i32, i32) {
    %c0_i32 = arith.constant 0 : i32
    %c0_i32_0 = arith.constant 0 : i32
    %c0_i32_1 = arith.constant 0 : i32
    return %c0_i32, %c0_i32_0 : i32, i32
  }
  func.func @transform_3(%arg0: i32) -> (i32, i32) {
    %c0_i32 = arith.constant 0 : i32
    %c0_i32_0 = arith.constant 0 : i32
    %c0_i32_1 = arith.constant 0 : i32
    return %c0_i32, %c0_i32_0 : i32, i32
  }
  func.func @transform_4(%arg0: i32) -> (i32, i32) {
    %c0_i32 = arith.constant 0 : i32
    %c0_i32_0 = arith.constant 0 : i32
    %c0_i32_1 = arith.constant 0 : i32
    return %c0_i32, %c0_i32_0 : i32, i32
  }
  func.func @transform_5(%arg0: i32) -> (i32, i32) {
    %c0_i32 = arith.constant 0 : i32
    %c0_i32_0 = arith.constant 0 : i32
    return %arg0, %c0_i32 : i32, i32
  }
}

</mosaic_0001>

<bundles_post_ra>
// kernel: mlp_projector.1
= control target key start
LH: loop header
LB: loop body
LE: loop exit
PB: predicated region body
PF: predicated region fallthrough
CT: control target
= control target key end

     0   :  { %10 = vsyncpa [#allocation3], 0  ;;  %s953_s0 = inlined_call_operand.hbm [shape: f32[16,90], index: 0, kind: input, shape index: {}]   ;;  %s954_s1 = inlined_call_operand.hbm [shape: f32[90,128], index: 1, kind: input, shape index: {}]   ;;  %s955_s2 = inlined_call_operand.vmem [shape: f32[1,128], index: 2, kind: input, shape index: {}]   ;;  %s956_s3 = inlined_call_operand.hbm [shape: f32[128,128], index: 3, kind: input, shape index: {}]   ;;  %s957_s4 = inlined_call_operand.vmem [shape: f32[1,128], index: 4, kind: input, shape index: {}]   ;;  %s958_s5 = inlined_call_operand.hbm [shape: f32[16,128], index: 5, kind: output, shape index: {}]  }
   0x1   :  { %12 = vsyncpa [#allocation3 + $0x1], 0 }
   0x2   :  { %13 = vsyncpa [#allocation6], 0 }
   0x3   :  { %14 = vsyncpa [#allocation4], 0 }
   0x4   :  { %16 = vsyncpa [#allocation4 + $0x1], 0  ;;  %s798_s18 = smov 0   ;;  %s800_s19 = smov 0  }
   0x5   :  { %s802_s20 = smov 0   ;;  %s804_s21 = smov 0  }
   0x6 LB: > { %s174_s24 = sshll.u32 %s954_s1, 4  ;;  %s822_s25 = sadd.s32 4294967295, %s762_s21   ;;  %s762_s21 = sphi %s804_s21, %s969_s21   ;;  %s758_s20 = sphi %s802_s20, %s968_s20   ;;  %s754_s19 = sphi %s800_s19, %s967_s19   ;;  %s750_s18 = sphi %s798_s18, %s966_s18   ;;  %s175_s24 = int_to_ptr.hbm [resolvable:$true] %s174_s24 }
   0x7   : > { %p511_p0 = scmp.ge.s32.totalorder %s762_s21, 1  ;;  %p43_p1 = scmp.eq.s32.totalorder %s822_s25, 0 }
   0x8   : > { %p163_p2 = scmp.lt.s32.totalorder %s762_s21, 3  ;;  %s764_s27 = smov [#allocation5]  }
   0x9   : > { %s176_s28 = sshll.u32 %s764_s27, 4  ;;  %s191_s6 = sshll.u32 %s956_s3, 4  ;;  %s177_s28 = int_to_ptr.vmem [resolvable:$true] %s176_s28  ;;  %s192_s6 = int_to_ptr.hbm [resolvable:$true] %s191_s6 }
   0xa   : > { %p827_p3 = pnand %p511_p0, %p163_p2  ;;  %s765_s7 = smov [#allocation7]  }
   0xb   : > { %s193_s8 = sshll.u32 %s765_s7, 4  ;;  %s766_s9 = smov 128   ;;  %s194_s8 = int_to_ptr.vmem [resolvable:$true] %s193_s8 }
   0xc   : > { %p541_p4 = pneg %p827_p3  ;;  %s767_s10 = smov 8  }
   0xd   : > { %s510_s11 = sadd.s32 4294967294, %s762_s21   ;;  %s841_s12 = sadd.s32 1, %s762_s21  }
   0xe   : > { %p542_p6 = pnand %p541_p4, %p43_p1  ;;  %s26_s13 = ssub.s32 %s762_s21, %s841_s12 }
   0xf   : > { %s29_s14 = sadd.s32 1, %s758_s20  ;;  %p27_p7 = scmp.eq.s32.totalorder %s26_s13, 0 }
  0x10   : > { %544 = dma.hbm_to_vmem [thread:$0]  (!%p542_p6), %s175_s24, 1536, %s177_s28, [#allocation6], %s766_s9, %s766_s9, %s767_s10  }
  0x11   : > { %547 = dma.hbm_to_vmem [thread:$0]  (!%p542_p6), %s192_s6, 2048, %s194_s8, [#allocation6], %s766_s9, %s766_s9, %s767_s10  }
  0x12   : > { %p36_p8 = scmp.ne.s32.totalorder %s758_s20, %s754_s19  ;;  %p37_p9 = scmp.eq.s32.totalorder %s762_s21, 0 }
  0x13   : > { %p42_p10 = scmp.ne.s32.totalorder %s754_s19, %s750_s18  ;;  %p150_p13 = scmp.eq.s32.totalorder %s822_s25, 1 }
  0x14   : > { %s852_s15 = scalar_select %p27_p7, %s758_s20, %s29_s14  }
  0x15   : > { %p854_p11 = por %p37_p9, %p36_p8  ;;  %p860_p12 = por %p43_p1, %p42_p10 }
  0x16   : > { %p156_p0 = scmp.eq.s32.totalorder %s510_s11, 1  ;;  %p558_p2 = scmp.lt.s32.totalorder %s762_s21, 2 }
  0x17   : > { %s210_s22 = sand.u32 1, %s758_s20   ;;  %p867_p4 = por %p150_p13, %p36_p8 }
  0x18   : > { %p871_p6 = por %p156_p0, %p42_p10  ;;  %s515_s27 = sshll.u32 %s210_s22, 3 }
  0x19   : > { %s516_s28 = sshll.u32 %s762_s21, 3  ;;  %s214_s7 = scalar_lea.vmem [#allocation2], %s515_s27 }
  0x1a   : > { %s218_s6 = scalar_lea.hbm %s953_s0, %s516_s28  ;;  %s222_s8 = sshll.u32 %s214_s7, 4  ;;  %s223_s8 = int_to_ptr.vmem [resolvable:$true] %s222_s8 }
  0x1b   : > { %s220_s9 = sshll.u32 %s218_s6, 4  ;;  %p881_p7 = pnand %p558_p2, %p854_p11  ;;  %s221_s9 = int_to_ptr.hbm [resolvable:$true] %s220_s9 }
  0x1c   : > { %s211_s11 = scalar_lea.sflag [#allocation3], %s210_s22  ;;  %s662_s13 = sshra.s32 %s221_s9, 4  ;;  %s663_s13 = int_to_ptr.hbm [resolvable:$true] %s662_s13 }
  0x1d   : > { %s664_s14 = scalar_lea.hbm %s663_s13, 8  ;;  %p666_p9 = pneg %p881_p7 }
  0x1e   : > { %p665_p8 = scmp.ne.s32.totalorder %s663_s13, %s664_s14  ;;  %s669_s29 = scalar_lea.hbm %s953_s0, 16 }
  0x1f   : > { %p670_p11 = scmp.lt.s32.totalorder %s663_s13, %s953_s0  ;;  %p671_p0 = scmp.lt.s32.totalorder %s669_s29, %s664_s14 }
  0x20   : > { %p667_p10 = pnand %p666_p9, %p665_p8 }
  0x21   : > { %p672_p2 = por %p671_p0, %p670_p11 }
  0x22   : > { %p668_p13 = pneg %p667_p10 }
  0x24   : > { %p673_p5 = pnand %p672_p2, %p668_p13 }
  0x26   : > { %676 = shalt.err (!%p673_p5)
}
  0x27   : > { %551 = dma.hbm_to_vmem [thread:$0]  (!%p881_p7), %s221_s9, 128, %s223_s8, %s211_s11  }
  0x28   : > { %231 = sbr.rel (%p827_p3) target bundleno = 382 (0x17e), region = 40  ;;  %s898_s22 = sand.u32 (!%p827_p3), 1, %s754_s19  }
  0x29   : > { %s518_s6 = sshll.u32 (!%p827_p3), %s898_s22, 3  ;;  %s234_s7 = scalar_lea.sflag (!%p827_p3), [#allocation3], %s898_s22 }
  0x2a   : > { %s237_s13 = scalar_lea.vmem (!%p827_p3), [#allocation2], %s518_s6 }
  0x2d   : > { %737 = dma.done.wait (%p860_p12), %s234_s7, 128  }
  0x2e   : > { %739 = vsyncadd (%p860_p12), %s234_s7, 4294967168 }
  0x2f   : > { %741 = dma.done.wait (%p43_p1), [#allocation6], 3584  }
  0x30   : > { %743 = vsyncadd (%p43_p1), [#allocation6], 4294963712  ;;  %vm312_vm0 = vcmask 1041408   ;;  %v287_v0 = vld [vmem:[#allocation5 + $0x58] sm:$0x3]  ;;  %v286_v1 = vld [vmem:[#allocation5 + $0x50] sm:$0xff] }
  0x31   : > { %522 = vmatpush.msk.msra.mxu0 %vm312_vm0, %v287_v0  ;;  %v285_v2 = vld [vmem:[#allocation5 + $0x48] sm:$0xff]  ;;  %v284_v3 = vld [vmem:[#allocation5 + $0x40] sm:$0xff]  ;;  %v283_v4 = vld [vmem:[#allocation5 + $0x38] sm:$0xff]  ;;  %vm308_vm1 = vcmask 736256   ;;  %s526_s8 = sshll.u32 %s822_s25, 3  ;;  %s274_s28 = scalar_lea.vmem [#allocation8], %s518_s6 }
  0x32   : > { %v282_v5 = vld [vmem:[#allocation5 + $0x30] sm:$0xff]  ;;  %v281_v6 = vld [vmem:[#allocation5 + $0x28] sm:$0xff]  ;;  %v280_v7 = vld [vmem:[#allocation5 + $0x20] sm:$0xff]  ;;  %s416_s11 = scalar_lea.hbm %s958_s5, %s526_s8  ;;  %s418_s29 = sshll.u32 %s274_s28, 4  ;;  %s419_s29 = int_to_ptr.vmem [resolvable:$true] %s418_s29 }
  0x33   : > { %321 = vmatpush.msra.mxu0 %v286_v1  ;;  %v279_v8 = vld [vmem:[#allocation5 + $0x18] sm:$0xff]  ;;  %v278_v9 = vld [vmem:[#allocation5 + $0x10] sm:$0xff]  ;;  %v277_v10 = vld [vmem:[#allocation5 + $0x8] sm:$0xff]  ;;  %s420_s30 = sshll.u32 %s416_s11, 4  ;;  %s406_s16 = scalar_lea.sflag [#allocation4], %s898_s22  ;;  %s421_s30 = int_to_ptr.hbm [resolvable:$true] %s420_s30 }
  0x34   : > { %v276_v11 = vld [vmem:[#allocation5] sm:$0xff]  ;;  %v275_v12 = vld [vmem:[%s237_s13] sm:$0xff]  ;;  %v301_v15 = vld [vmem:[#allocation7 + $0x68] sm:$0xff]  ;;  %s706_s25 = sshra.s32 %s421_s30, 4  ;;  %s712_s17 = scalar_lea.hbm %s958_s5, 16  ;;  %s707_s25 = int_to_ptr.hbm [resolvable:$true] %s706_s25 }
  0x35   : > { %322 = vmatpush.msra.mxu0 %v285_v2  ;;  %v303_v13 = vld [vmem:[#allocation7 + $0x78] sm:$0xff]  ;;  %v302_v14 = vld [vmem:[#allocation7 + $0x70] sm:$0xff]  ;;  %v300_v16 = vld [vmem:[#allocation7 + $0x60] sm:$0xff]  ;;  %s708_s7 = scalar_lea.hbm %s707_s25, 8  ;;  %p713_p12 = scmp.lt.s32.totalorder %s707_s25, %s958_s5 }
  0x36   : > { %384 = vmatpush.msra.mxu1 %v303_v13  ;;  %v598_v17 = vld [vmem:[%s955_s2] ss:$0 sm:$0xff]  ;;  %v299_v18 = vld [vmem:[#allocation7 + $0x58] sm:$0xff]  ;;  %v297_v21 = vld [vmem:[#allocation7 + $0x48] sm:$0xff]  ;;  %p709_p1 = scmp.ne.s32.totalorder %s707_s25, %s708_s7  ;;  %p714_p7 = scmp.lt.s32.totalorder %s712_s17, %s708_s7 }
  0x37   : > { %323 = vmatpush.msra.mxu0 %v284_v3  ;;  %v298_v19 = vld [vmem:[#allocation7 + $0x50] sm:$0xff]  ;;  %v296_v23 = vld [vmem:[#allocation7 + $0x40] sm:$0xff]  ;;  %v295_v25 = vld [vmem:[#allocation7 + $0x38] sm:$0xff] }
  0x38   : > { %385 = vmatpush.msra.mxu1 %v302_v14  ;;  %v294_v27 = vld [vmem:[#allocation7 + $0x30] sm:$0xff]  ;;  %v293_v29 = vld [vmem:[#allocation7 + $0x28] sm:$0xff]  ;;  %v292_v32 = vld [vmem:[#allocation7 + $0x20] sm:$0xff]  ;;  %p710_p3 = pnand %p709_p1, %p867_p4  ;;  %p715_p8 = por %p714_p7, %p713_p12 }
  0x39   : > { %324 = vmatpush.msra.mxu0 %v283_v4  ;;  %v291_v35 = vld [vmem:[#allocation7 + $0x18] sm:$0xff]  ;;  %v290_v38 = vld [vmem:[#allocation7 + $0x10] sm:$0xff]  ;;  %v289_v41 = vld [vmem:[#allocation7 + $0x8] sm:$0xff] }
  0x3a   : > { %386 = vmatpush.msra.mxu1 %v301_v15  ;;  %v288_v43 = vld [vmem:[#allocation7] sm:$0xff]  ;;  %p711_p5 = pneg %p710_p3 }
  0x3b   : > { %325 = vmatpush.msra.mxu0 %v282_v5 }
  0x3c   : > { %387 = vmatpush.msra.mxu1 %v300_v16  ;;  %p716_p9 = pnand %p715_p8, %p711_p5 }
  0x3d   : > { %326 = vmatpush.msra.mxu0 %v281_v6 }
  0x3e   : > { %388 = vmatpush.msra.mxu1 %v299_v18 }
  0x3f   : > { %327 = vmatpush.msra.mxu0 %v280_v7  ;;  %v599_v7 = vld [vmem:[%s957_s4] ss:$0 sm:$0xff] }
  0x40   : > { %389 = vmatpush.msra.mxu1 %v298_v19 }
  0x41   : > { %328 = vmatpush.msra.mxu0 %v279_v8 }
  0x42   : > { %390 = vmatpush.msra.mxu1 %v297_v21 }
  0x43   : > { %329 = vmatpush.msra.mxu0 %v278_v9 }
  0x44   : > { %391 = vmatpush.msra.mxu1 %v296_v23 }
  0x45   : > { %330 = vmatpush.msra.mxu0 %v277_v10 }
  0x46   : > { %392 = vmatpush.msra.mxu1 %v295_v25 }
  0x47   : > { %331 = vmatpush.msra.mxu0 %v276_v11 }
  0x48   : > { %523 = vmatmul.msk.f32.vlgmr.msra.gmra.mxu0 %vm308_vm1, %v275_v12  ;;  %393 = vmatpush.msra.mxu1 %v294_v27 }
  0x4a   : > { %394 = vmatpush.msra.mxu1 %v293_v29 }
  0x4c   : > { %395 = vmatpush.msra.mxu1 %v292_v32 }
  0x4e   : > { %396 = vmatpush.msra.mxu1 %v291_v35 }
  0x50   : > { %397 = vmatpush.msra.mxu1 %v290_v38 }
  0x52   : > { %398 = vmatpush.msra.mxu1 %v289_v41 }
  0x54   : > { %399 = vmatpush.msra.mxu1 %v288_v43 }
  0xc5   : > { %v333_v20 = vpop.f32.mrf.mxu0 }
  0xc6   : > { %v334_v22 = vadd.f32 %v598_v17, %v333_v20 }
  0xc8   : > { %v337_v24 = vmul.f32 0.70710677, %v334_v22  ;;  %v336_v4 = vmul.f32 0.5, %v334_v22 }
  0xca   : > { %v338_v26 = vmul.f32 %v337_v24, %v337_v24 }
  0xcc   : > { %v339_v28 = vmin.f32 %v338_v26, 16.0 }
  0xce   : > { %v340_v30 = vmul.f32 2.1237322e-06, %v339_v28  ;;  %v351_v31 = vmul.f32 3.8918573e-05, %v339_v28 }
  0xd0   : > { %v341_v33 = vadd.f32 0.00028619796, %v340_v30  ;;  %v352_v34 = vadd.f32 0.001143296, %v351_v31 }
  0xd2   : > { %v342_v36 = vmul.f32 %v341_v33, %v339_v28  ;;  %v353_v37 = vmul.f32 %v352_v34, %v339_v28 }
  0xd4   : > { %v354_v39 = vadd.f32 0.014752088, %v353_v37  ;;  %v343_v40 = vadd.f32 0.0036580483, %v342_v36 }
  0xd6   : > { %v355_v42 = vmul.f32 %v354_v39, %v339_v28  ;;  %v344_v45 = vmul.f32 %v343_v40, %v339_v28 }
  0xd8   : > { %v356_v44 = vadd.f32 0.112945676, %v355_v42  ;;  %v345_v48 = vadd.f32 0.05243302, %v344_v45 }
  0xda   : > { %v357_v46 = vmul.f32 %v356_v44, %v339_v28  ;;  %v346_v51 = vmul.f32 %v345_v48, %v339_v28 }
  0xdc   : > { %v358_v47 = vadd.f32 0.4994258, %v357_v46  ;;  %v347_v52 = vadd.f32 0.18741608, %v346_v51 }
  0xde   : > { %v359_v49 = vmul.f32 %v358_v47, %v339_v28  ;;  %v348_v54 = vmul.f32 %v347_v52, %v339_v28 }
  0xe0   : > { %v360_v50 = vadd.f32 1.0, %v359_v49  ;;  %v349_v58 = vadd.f32 1.1283791, %v348_v54 }
  0xe2   : > { %600 = vrcp.f32 %v360_v50  ;;  %v372_v57 = vand.u32 2147483648, %v360_v50  ;;  %v370_v60 = vand.u32 2147483647, %v360_v50  ;;  %vm366_vm3 = vweird.f32 %v360_v50 }
  0xe3   : > { %v350_v63 = vmul.f32 %v349_v58, %v337_v24 }
  0xe4   : > { %v373_v62 = vor.u32 1.1754944e-38, %v372_v57  ;;  %vm371_vm5 = vcmp.eq.f32.partialorder %v370_v60, 8.507059e+37 }
  0xe8   : > { %v601_v53 = vpop.eup %600 }
  0xe9   : > { %v362_v55 = vmul.f32 %v601_v53, %v360_v50  ;;  %vm367_vm2 = vweird.f32 %v601_v53 }
  0xea   : > { %vm368_vm4 = vmor %vm366_vm3, %vm367_vm2 }
  0xeb   : > { %v363_v56 = vsub.f32 1.0, %v362_v55 }
  0xed   : > { %v364_v59 = vmul.f32 %v601_v53, %v363_v56 }
  0xef   : > { %v365_v61 = vadd.f32 %v601_v53, %v364_v59 }
  0xf1   : > { %v369_v0 = vsel %vm368_vm4, %v601_v53, %v365_v61 }
  0xf2   : > { %v374_v1 = vsel %vm371_vm5, %v373_v62, %v369_v0 }
  0xf3   : > { %v375_v2 = vmul.f32 %v374_v1, %v350_v63 }
  0xf5   : > { %v524_v3 = vclamps-f32 %v375_v2, 1.0 }
  0xf7   : > { %v378_v5 = vadd.f32 1.0, %v524_v3 }
  0xf9   : > { %v379_v6 = vmul.f32 %v378_v5, %v336_v4 }
  0xfb   : > { %400 = vmatmul.f32.vlgmr.msra.gmra.mxu1 %v379_v6 }
 0x178   : > { %v401_v8 = vpop.f32.mrf.mxu1 }
 0x179   : > { %v402_v9 = vadd.f32 %v599_v7, %v401_v8 }
 0x17b   : > { %404 = vst [vmem:[%s274_s28] sm:$0xff] %v402_v9 }
 0x17c   : > { %719 = shalt.err (!%p716_p9)
}
 0x17d   : > { %539 = dma.vmem_to_hbm [thread:$0]  (%p867_p4), %s419_s29, 128, %s421_s30, %s406_s16  }
 0x17e PF: > { %s432_s22 = sand.u32 1, %s750_s18   ;;  %p965_p10 = scmp.ge.s32.totalorder %s762_s21, 2 }
 0x17f   : > { %s433_s9 = scalar_lea.sflag [#allocation4], %s432_s22 }
 0x180   : > { %p553_p13 = pnand %p965_p10, %p871_p6 }
 0x182   : > { %p554_p11 = pneg %p553_p13 }
 0x184   : > { %745 = dma.done.wait (%p554_p11), %s433_s9, 128  }
 0x185   : > { %747 = vsyncadd (%p554_p11), %s433_s9, 4294967168  ;;  %p19_p0 = scmp.ge.s32.totalorder %s841_s12, 4   ;;  %s966_s18 = smov %s754_s19 }
 0x186   : > { %s967_s19 = smov %s758_s20  ;;  %s968_s20 = smov %s852_s15 }
 0x187   : > { %s969_s21 = smov %s841_s12  ;;  %21 = sbr.rel (!%p19_p0) target bundleno = 6 (0x6), region = 93 }
 0x18c   :  { %439 = vsyncpa [#allocation3], 1 }
 0x18d   :  { %441 = vsyncpa [#allocation3 + $0x1], 1 }
 0x18e   :  { %442 = vsyncpa [#allocation6], 1 }
 0x18f   :  { %443 = vsyncpa [#allocation4], 1 }
 0x190   :  { %445 = vsyncpa [#allocation4 + $0x1], 1 }

</bundles_post_ra>
